<compile_context>
chip_gen: v5e
topology: v5e:2x2
jax: 0.10.0
libtpu: 0.0.40
codegen_flags: <defaults>
</compile_context>

<pallas_src>
import jax
import jax.numpy as jnp
from jax import lax
from jax.experimental import pallas as pl
from jax.experimental.pallas import tpu as pltpu

N_EMBD = 64
NUM_HEADS = 4
HEAD_SIZE = N_EMBD // NUM_HEADS  # 16


def mha_kernel(x_ref, wqkv_ref, wo_ref, bo_ref, o_ref):
    # x_ref block: (bb, T, C); weights are whole, already bf16, resident.
    bb, T, C = x_ref.shape

    wqkv = wqkv_ref[...]                              # (C, 3C) bf16
    wo = wo_ref[...]                                  # (C, C)  bf16

    # One fused, lane-dense QKV projection over all bb*T rows; f32 MXU acc.
    # Column layout: [Q_h0..Q_h3 | K_h0..K_h3 | V_h0..V_h3], each hs lanes.
    x2d = x_ref[...].reshape(bb * T, C).astype(jnp.bfloat16)
    qkv = jnp.dot(x2d, wqkv, preferred_element_type=jnp.float32)  # (bb*T, 3C)

    # Single cast of the projections; q/k/v below are static (free) slices.
    qkv_bf = qkv.astype(jnp.bfloat16)

    # Causal mask built once per invocation. Large-negative fill (not -inf)
    # keeps the exp/normalize path NaN-safe.
    row = lax.broadcasted_iota(jnp.int32, (T, T), 0)
    col = lax.broadcasted_iota(jnp.int32, (T, T), 1)
    causal = col <= row
    neg_big = jnp.float32(-1e30)

    bias = bo_ref[...]                                # (1, C) f32

    for b in range(bb):                               # static unroll (bb small)
        base = b * T
        head_outs = []
        for h in range(NUM_HEADS):                    # static unroll over heads
            q = qkv_bf[base:base + T, h * HEAD_SIZE:(h + 1) * HEAD_SIZE]
            k = qkv_bf[base:base + T,
                       N_EMBD + h * HEAD_SIZE:N_EMBD + (h + 1) * HEAD_SIZE]
            v = qkv_bf[base:base + T,
                       2 * N_EMBD + h * HEAD_SIZE:2 * N_EMBD + (h + 1) * HEAD_SIZE]

            # q already carries the 1/sqrt(hs) scale (folded into Wq wrapper-side).
            att = lax.dot_general(
                q, k, (((1,), (1,)), ((), ())),
                preferred_element_type=jnp.float32)                  # (T, T) f32
            att = jnp.where(causal, att, neg_big)
            att = att - jnp.max(att, axis=-1, keepdims=True)         # stable softmax
            p = jnp.exp(att)
            l = jnp.sum(p, axis=-1, keepdims=True)                   # (T, 1)

            # Unnormalized p @ v, then deferred normalization on (T, hs)
            # via an exact EUP reciprocal (cheaper than dividing (T, T)).
            ov = jnp.dot(p.astype(jnp.bfloat16), v,
                         preferred_element_type=jnp.float32)         # (T, hs)
            ov = ov * pl.reciprocal(l, approx=False)
            head_outs.append(ov.astype(jnp.bfloat16))

        # Lane-axis concat of the 4 head outputs (XLU work, otherwise idle),
        # then ONE 64-deep projection push instead of four 16-deep ones.
        cat = jnp.concatenate(head_outs, axis=-1)                    # (T, C) bf16
        y = jnp.dot(cat, wo, preferred_element_type=jnp.float32) + bias
        o_ref[b] = y.astype(o_ref.dtype)


def multi_head_attention(x, wq, wk, wv, wo, bo):
    """x: (B, T, C); wq/wk/wv: (H, C, hs); wo: (C, C); bo: (1, C)."""
    B, T, C = x.shape
    scale = HEAD_SIZE ** -0.5

    # Fuse per-head Q/K/V projections into one (C, 3C) weight; fold the
    # attention scale into the Q columns (before the bf16 cast), then pre-cast
    # to bf16 so the kernel does no weight casting and weight DMA is halved.
    wq_cat = jnp.moveaxis(wq * scale, 0, 1).reshape(C, C)   # (C, C) = [Q_h0..Q_h3]
    wk_cat = jnp.moveaxis(wk, 0, 1).reshape(C, C)
    wv_cat = jnp.moveaxis(wv, 0, 1).reshape(C, C)
    wqkv = jnp.concatenate([wq_cat, wk_cat, wv_cat], axis=-1).astype(jnp.bfloat16)
    wo_bf = wo.astype(jnp.bfloat16)

    # Batch-grid collapse: at most 2 grid steps. Two steps keep both v7x
    # TensorCores busy; on single-TC v5e/v6e the extra step costs ~0.35 us
    # while each step still gets a row-batched (bb*T, C) QKV matmul.
    nb = 2 if (B % 2 == 0 and B >= 2) else 1
    bb = B // nb

    return pl.pallas_call(
        mha_kernel,
        out_shape=jax.ShapeDtypeStruct((B, T, C), x.dtype),
        grid_spec=pltpu.PrefetchScalarGridSpec(
            num_scalar_prefetch=0,
            grid=(nb,),
            in_specs=[
                pl.BlockSpec((bb, T, C), lambda i: (i, 0, 0)),
                pl.BlockSpec((C, 3 * C), lambda i: (0, 0)),   # resident bf16 weights
                pl.BlockSpec((C, C), lambda i: (0, 0)),
                pl.BlockSpec((1, C), lambda i: (0, 0)),
            ],
            out_specs=pl.BlockSpec((bb, T, C), lambda i: (i, 0, 0)),
        ),
        compiler_params=pltpu.CompilerParams(
            dimension_semantics=("parallel",)   # one half-batch per TC on v7x
        ),
    )(x, wqkv, wo_bf, bo)


def reference_mha(x, wq, wk, wv, wo, bo):
    B, T, C = x.shape
    outs = []
    mask = jnp.tril(jnp.ones((T, T), dtype=bool))
    for h in range(NUM_HEADS):
        q = x @ wq[h]
        k = x @ wk[h]
        v = x @ wv[h]
        att = (q @ jnp.swapaxes(k, -1, -2)) * HEAD_SIZE ** -0.5
        att = jnp.where(mask, att, -jnp.inf)
        att = jax.nn.softmax(att, axis=-1)
        outs.append(att @ v)
    cat = jnp.concatenate(outs, axis=-1)
    return cat @ wo + bo


if __name__ == "__main__":
    B, T, C = 2, 8, N_EMBD

    key = jax.random.PRNGKey(0)
    kx, kq, kk, kv, kwo, kbo = jax.random.split(key, 6)

    x = jax.random.normal(kx, (B, T, C), dtype=jnp.float32)
    # Deterministic parameter init (PyTorch-Linear-like uniform fan-in scaling).
    bound = 1.0 / (C ** 0.5)
    wq = jax.random.uniform(kq, (NUM_HEADS, C, HEAD_SIZE), jnp.float32, -bound, bound)
    wk = jax.random.uniform(kk, (NUM_HEADS, C, HEAD_SIZE), jnp.float32, -bound, bound)
    wv = jax.random.uniform(kv, (NUM_HEADS, C, HEAD_SIZE), jnp.float32, -bound, bound)
    wo = jax.random.uniform(kwo, (C, C), jnp.float32, -bound, bound)
    bo = jax.random.uniform(kbo, (1, C), jnp.float32, -bound, bound)

    out = multi_head_attention(x, wq, wk, wv, wo, bo)
    out = jax.block_until_ready(out)

    ref = reference_mha(x, wq, wk, wv, wo, bo)
    assert out.shape == (B, T, C)
    # bf16 MXU operands (f32 accumulation) -> relaxed tolerance vs pure f32.
    assert jnp.allclose(out, ref, atol=5e-2, rtol=5e-2), "mismatch vs reference"

    print("KERNEL_OK")
</pallas_src>

<mosaic_0001>
module attributes {stable_mosaic.version = 11 : i64} {
  func.func @mha_kernel(%arg0: i32, %arg1: memref<1x8x64xf32, #tpu.memory_space<vmem>>, %arg2: memref<64x192xbf16, #tpu.memory_space<vmem>>, %arg3: memref<64x64xbf16, #tpu.memory_space<vmem>>, %arg4: memref<1x64xf32, #tpu.memory_space<vmem>>, %arg5: memref<1x8x64xf32, #tpu.memory_space<vmem>>) attributes {dimension_semantics = [#tpu.dimension_semantics<parallel>], iteration_bounds = array<i64: 2>, scalar_prefetch = 0 : i64, scratch_operands = 0 : i64, tpu.core_type = #tpu.core_type<tc>, window_params = [{transform_indices = @transform_0, window_bounds = array<i64: 1, 8, 64>}, {pipeline_mode = #tpu.pipeline_mode<synchronous>, transform_indices = @transform_1, window_bounds = array<i64: 64, 192>}, {pipeline_mode = #tpu.pipeline_mode<synchronous>, transform_indices = @transform_2, window_bounds = array<i64: 64, 64>}, {pipeline_mode = #tpu.pipeline_mode<synchronous>, transform_indices = @transform_3, window_bounds = array<i64: 1, 64>}, {transform_indices = @transform_4, window_bounds = array<i64: 1, 8, 64>}]} {
    %c0 = arith.constant 0 : index
    %c0_0 = arith.constant 0 : index
    %0 = vector.load %arg2[%c0, %c0_0] : memref<64x192xbf16, #tpu.memory_space<vmem>>, vector<64x192xbf16>
    %c0_1 = arith.constant 0 : index
    %c0_2 = arith.constant 0 : index
    %1 = vector.load %arg3[%c0_1, %c0_2] : memref<64x64xbf16, #tpu.memory_space<vmem>>, vector<64x64xbf16>
    %c0_3 = arith.constant 0 : index
    %c0_4 = arith.constant 0 : index
    %c0_5 = arith.constant 0 : index
    %2 = vector.load %arg1[%c0_3, %c0_4, %c0_5] : memref<1x8x64xf32, #tpu.memory_space<vmem>>, vector<1x8x64xf32>
    %3 = vector.shape_cast %2 : vector<1x8x64xf32> to vector<8x64xf32>
    %4 = arith.truncf %3 : vector<8x64xf32> to vector<8x64xbf16>
    %cst = arith.constant dense<0.000000e+00> : vector<8x192xf32>
    %5 = tpu.matmul %4, %0, %cst {dimension_numbers = #tpu.dot_dimension_numbers<[1], [0], [0], [1], [0, 0, 1, 1], [], []>} : vector<8x64xbf16>, vector<64x192xbf16>, vector<8x192xf32> -> vector<8x192xf32>
    %6 = arith.truncf %5 : vector<8x192xf32> to vector<8x192xbf16>
    %7 = tpu.iota {dimensions = array<i32: 0>} : vector<8x8xi32>
    %8 = tpu.iota {dimensions = array<i32: 1>} : vector<8x8xi32>
    %9 = arith.cmpi sle, %8, %7 : vector<8x8xi32>
    %c0_6 = arith.constant 0 : index
    %c0_7 = arith.constant 0 : index
    %10 = vector.load %arg4[%c0_6, %c0_7] : memref<1x64xf32, #tpu.memory_space<vmem>>, vector<1x64xf32>
    %11 = vector.extract_strided_slice %6 {offsets = [0, 0], sizes = [8, 16], strides = [1, 1]} : vector<8x192xbf16> to vector<8x16xbf16>
    %12 = vector.extract_strided_slice %6 {offsets = [0, 64], sizes = [8, 16], strides = [1, 1]} : vector<8x192xbf16> to vector<8x16xbf16>
    %13 = vector.extract_strided_slice %6 {offsets = [0, 128], sizes = [8, 16], strides = [1, 1]} : vector<8x192xbf16> to vector<8x16xbf16>
    %cst_8 = arith.constant dense<0.000000e+00> : vector<8x8xf32>
    %14 = tpu.matmul %11, %12, %cst_8 {dimension_numbers = #tpu.dot_dimension_numbers<[1], [1], [0], [0], [0, 0, 1, 0], [], []>} : vector<8x16xbf16>, vector<8x16xbf16>, vector<8x8xf32> -> vector<8x8xf32>
    %cst_9 = arith.constant -1.000000e+30 : f32
    %15 = vector.broadcast %cst_9 : f32 to vector<8x8xf32>
    %16 = arith.select %9, %14, %15 : vector<8x8xi1>, vector<8x8xf32>
    %cst_10 = arith.constant dense<0xFF800000> : vector<8xf32>
    %17 = vector.multi_reduction <maximumf>, %16, %cst_10 [1] : vector<8x8xf32> to vector<8xf32>
    %18 = vector.shape_cast %17 : vector<8xf32> to vector<8x1xf32>
    %19 = vector.broadcast %18 : vector<8x1xf32> to vector<8x8xf32>
    %20 = arith.subf %16, %19 : vector<8x8xf32>
    %21 = math.exp %20 : vector<8x8xf32>
    %cst_11 = arith.constant dense<0.000000e+00> : vector<8xf32>
    %22 = vector.multi_reduction <add>, %21, %cst_11 [1] : vector<8x8xf32> to vector<8xf32>
    %23 = vector.shape_cast %22 : vector<8xf32> to vector<8x1xf32>
    %24 = arith.truncf %21 : vector<8x8xf32> to vector<8x8xbf16>
    %cst_12 = arith.constant dense<0.000000e+00> : vector<8x16xf32>
    %25 = tpu.matmul %24, %13, %cst_12 {dimension_numbers = #tpu.dot_dimension_numbers<[1], [0], [0], [1], [0, 0, 1, 1], [], []>} : vector<8x8xbf16>, vector<8x16xbf16>, vector<8x16xf32> -> vector<8x16xf32>
    %26 = tpu.reciprocal %23 : vector<8x1xf32> -> vector<8x1xf32>
    %27 = vector.broadcast %26 : vector<8x1xf32> to vector<8x16xf32>
    %28 = arith.mulf %25, %27 : vector<8x16xf32>
    %29 = arith.truncf %28 : vector<8x16xf32> to vector<8x16xbf16>
    %30 = vector.extract_strided_slice %6 {offsets = [0, 16], sizes = [8, 16], strides = [1, 1]} : vector<8x192xbf16> to vector<8x16xbf16>
    %31 = vector.extract_strided_slice %6 {offsets = [0, 80], sizes = [8, 16], strides = [1, 1]} : vector<8x192xbf16> to vector<8x16xbf16>
    %32 = vector.extract_strided_slice %6 {offsets = [0, 144], sizes = [8, 16], strides = [1, 1]} : vector<8x192xbf16> to vector<8x16xbf16>
    %cst_13 = arith.constant dense<0.000000e+00> : vector<8x8xf32>
    %33 = tpu.matmul %30, %31, %cst_13 {dimension_numbers = #tpu.dot_dimension_numbers<[1], [1], [0], [0], [0, 0, 1, 0], [], []>} : vector<8x16xbf16>, vector<8x16xbf16>, vector<8x8xf32> -> vector<8x8xf32>
    %cst_14 = arith.constant -1.000000e+30 : f32
    %34 = vector.broadcast %cst_14 : f32 to vector<8x8xf32>
    %35 = arith.select %9, %33, %34 : vector<8x8xi1>, vector<8x8xf32>
    %cst_15 = arith.constant dense<0xFF800000> : vector<8xf32>
    %36 = vector.multi_reduction <maximumf>, %35, %cst_15 [1] : vector<8x8xf32> to vector<8xf32>
    %37 = vector.shape_cast %36 : vector<8xf32> to vector<8x1xf32>
    %38 = vector.broadcast %37 : vector<8x1xf32> to vector<8x8xf32>
    %39 = arith.subf %35, %38 : vector<8x8xf32>
    %40 = math.exp %39 : vector<8x8xf32>
    %cst_16 = arith.constant dense<0.000000e+00> : vector<8xf32>
    %41 = vector.multi_reduction <add>, %40, %cst_16 [1] : vector<8x8xf32> to vector<8xf32>
    %42 = vector.shape_cast %41 : vector<8xf32> to vector<8x1xf32>
    %43 = arith.truncf %40 : vector<8x8xf32> to vector<8x8xbf16>
    %cst_17 = arith.constant dense<0.000000e+00> : vector<8x16xf32>
    %44 = tpu.matmul %43, %32, %cst_17 {dimension_numbers = #tpu.dot_dimension_numbers<[1], [0], [0], [1], [0, 0, 1, 1], [], []>} : vector<8x8xbf16>, vector<8x16xbf16>, vector<8x16xf32> -> vector<8x16xf32>
    %45 = tpu.reciprocal %42 : vector<8x1xf32> -> vector<8x1xf32>
    %46 = vector.broadcast %45 : vector<8x1xf32> to vector<8x16xf32>
    %47 = arith.mulf %44, %46 : vector<8x16xf32>
    %48 = arith.truncf %47 : vector<8x16xf32> to vector<8x16xbf16>
    %49 = vector.extract_strided_slice %6 {offsets = [0, 32], sizes = [8, 16], strides = [1, 1]} : vector<8x192xbf16> to vector<8x16xbf16>
    %50 = vector.extract_strided_slice %6 {offsets = [0, 96], sizes = [8, 16], strides = [1, 1]} : vector<8x192xbf16> to vector<8x16xbf16>
    %51 = vector.extract_strided_slice %6 {offsets = [0, 160], sizes = [8, 16], strides = [1, 1]} : vector<8x192xbf16> to vector<8x16xbf16>
    %cst_18 = arith.constant dense<0.000000e+00> : vector<8x8xf32>
    %52 = tpu.matmul %49, %50, %cst_18 {dimension_numbers = #tpu.dot_dimension_numbers<[1], [1], [0], [0], [0, 0, 1, 0], [], []>} : vector<8x16xbf16>, vector<8x16xbf16>, vector<8x8xf32> -> vector<8x8xf32>
    %cst_19 = arith.constant -1.000000e+30 : f32
    %53 = vector.broadcast %cst_19 : f32 to vector<8x8xf32>
    %54 = arith.select %9, %52, %53 : vector<8x8xi1>, vector<8x8xf32>
    %cst_20 = arith.constant dense<0xFF800000> : vector<8xf32>
    %55 = vector.multi_reduction <maximumf>, %54, %cst_20 [1] : vector<8x8xf32> to vector<8xf32>
    %56 = vector.shape_cast %55 : vector<8xf32> to vector<8x1xf32>
    %57 = vector.broadcast %56 : vector<8x1xf32> to vector<8x8xf32>
    %58 = arith.subf %54, %57 : vector<8x8xf32>
    %59 = math.exp %58 : vector<8x8xf32>
    %cst_21 = arith.constant dense<0.000000e+00> : vector<8xf32>
    %60 = vector.multi_reduction <add>, %59, %cst_21 [1] : vector<8x8xf32> to vector<8xf32>
    %61 = vector.shape_cast %60 : vector<8xf32> to vector<8x1xf32>
    %62 = arith.truncf %59 : vector<8x8xf32> to vector<8x8xbf16>
    %cst_22 = arith.constant dense<0.000000e+00> : vector<8x16xf32>
    %63 = tpu.matmul %62, %51, %cst_22 {dimension_numbers = #tpu.dot_dimension_numbers<[1], [0], [0], [1], [0, 0, 1, 1], [], []>} : vector<8x8xbf16>, vector<8x16xbf16>, vector<8x16xf32> -> vector<8x16xf32>
    %64 = tpu.reciprocal %61 : vector<8x1xf32> -> vector<8x1xf32>
    %65 = vector.broadcast %64 : vector<8x1xf32> to vector<8x16xf32>
    %66 = arith.mulf %63, %65 : vector<8x16xf32>
    %67 = arith.truncf %66 : vector<8x16xf32> to vector<8x16xbf16>
    %68 = vector.extract_strided_slice %6 {offsets = [0, 48], sizes = [8, 16], strides = [1, 1]} : vector<8x192xbf16> to vector<8x16xbf16>
    %69 = vector.extract_strided_slice %6 {offsets = [0, 112], sizes = [8, 16], strides = [1, 1]} : vector<8x192xbf16> to vector<8x16xbf16>
    %70 = vector.extract_strided_slice %6 {offsets = [0, 176], sizes = [8, 16], strides = [1, 1]} : vector<8x192xbf16> to vector<8x16xbf16>
    %cst_23 = arith.constant dense<0.000000e+00> : vector<8x8xf32>
    %71 = tpu.matmul %68, %69, %cst_23 {dimension_numbers = #tpu.dot_dimension_numbers<[1], [1], [0], [0], [0, 0, 1, 0], [], []>} : vector<8x16xbf16>, vector<8x16xbf16>, vector<8x8xf32> -> vector<8x8xf32>
    %cst_24 = arith.constant -1.000000e+30 : f32
    %72 = vector.broadcast %cst_24 : f32 to vector<8x8xf32>
    %73 = arith.select %9, %71, %72 : vector<8x8xi1>, vector<8x8xf32>
    %cst_25 = arith.constant dense<0xFF800000> : vector<8xf32>
    %74 = vector.multi_reduction <maximumf>, %73, %cst_25 [1] : vector<8x8xf32> to vector<8xf32>
    %75 = vector.shape_cast %74 : vector<8xf32> to vector<8x1xf32>
    %76 = vector.broadcast %75 : vector<8x1xf32> to vector<8x8xf32>
    %77 = arith.subf %73, %76 : vector<8x8xf32>
    %78 = math.exp %77 : vector<8x8xf32>
    %cst_26 = arith.constant dense<0.000000e+00> : vector<8xf32>
    %79 = vector.multi_reduction <add>, %78, %cst_26 [1] : vector<8x8xf32> to vector<8xf32>
    %80 = vector.shape_cast %79 : vector<8xf32> to vector<8x1xf32>
    %81 = arith.truncf %78 : vector<8x8xf32> to vector<8x8xbf16>
    %cst_27 = arith.constant dense<0.000000e+00> : vector<8x16xf32>
    %82 = tpu.matmul %81, %70, %cst_27 {dimension_numbers = #tpu.dot_dimension_numbers<[1], [0], [0], [1], [0, 0, 1, 1], [], []>} : vector<8x8xbf16>, vector<8x16xbf16>, vector<8x16xf32> -> vector<8x16xf32>
    %83 = tpu.reciprocal %80 : vector<8x1xf32> -> vector<8x1xf32>
    %84 = vector.broadcast %83 : vector<8x1xf32> to vector<8x16xf32>
    %85 = arith.mulf %82, %84 : vector<8x16xf32>
    %86 = arith.truncf %85 : vector<8x16xf32> to vector<8x16xbf16>
    %87 = tpu.concatenate %29, %48, %67, %86 in 1 : vector<8x16xbf16>, vector<8x16xbf16>, vector<8x16xbf16>, vector<8x16xbf16> -> vector<8x64xbf16>
    %cst_28 = arith.constant dense<0.000000e+00> : vector<8x64xf32>
    %88 = tpu.matmul %87, %1, %cst_28 {dimension_numbers = #tpu.dot_dimension_numbers<[1], [0], [0], [1], [0, 0, 1, 1], [], []>} : vector<8x64xbf16>, vector<64x64xbf16>, vector<8x64xf32> -> vector<8x64xf32>
    %89 = vector.broadcast %10 : vector<1x64xf32> to vector<8x64xf32>
    %90 = arith.addf %88, %89 : vector<8x64xf32>
    %c0_29 = arith.constant 0 : index
    %c0_30 = arith.constant 0 : index
    %c0_31 = arith.constant 0 : index
    %91 = vector.load %arg5[%c0_29, %c0_30, %c0_31] : memref<1x8x64xf32, #tpu.memory_space<vmem>>, vector<1x8x64xf32>
    %92 = vector.shape_cast %91 : vector<1x8x64xf32> to vector<8x64xf32>
    %93 = vector.shape_cast %90 : vector<8x64xf32> to vector<1x8x64xf32>
    tpu.vector_store %arg5[%c0_29, %c0_30, %c0_31], %93 {strides = array<i32>} : memref<1x8x64xf32, #tpu.memory_space<vmem>>, vector<1x8x64xf32>,
    return
  }
  func.func @transform_0(%arg0: i32) -> (i32, i32, i32) {
    %c0_i32 = arith.constant 0 : i32
    %c0_i32_0 = arith.constant 0 : i32
    %c0_i32_1 = arith.constant 0 : i32
    return %arg0, %c0_i32, %c0_i32_0 : i32, i32, i32
  }
  func.func @transform_1(%arg0: i32) -> (i32, i32) {
    %c0_i32 = arith.constant 0 : i32
    %c0_i32_0 = arith.constant 0 : i32
    %c0_i32_1 = arith.constant 0 : i32
    return %c0_i32, %c0_i32_0 : i32, i32
  }
  func.func @transform_2(%arg0: i32) -> (i32, i32) {
    %c0_i32 = arith.constant 0 : i32
    %c0_i32_0 = arith.constant 0 : i32
    %c0_i32_1 = arith.constant 0 : i32
    return %c0_i32, %c0_i32_0 : i32, i32
  }
  func.func @transform_3(%arg0: i32) -> (i32, i32) {
    %c0_i32 = arith.constant 0 : i32
    %c0_i32_0 = arith.constant 0 : i32
    %c0_i32_1 = arith.constant 0 : i32
    return %c0_i32, %c0_i32_0 : i32, i32
  }
  func.func @transform_4(%arg0: i32) -> (i32, i32, i32) {
    %c0_i32 = arith.constant 0 : i32
    %c0_i32_0 = arith.constant 0 : i32
    %c0_i32_1 = arith.constant 0 : i32
    return %arg0, %c0_i32, %c0_i32_0 : i32, i32, i32
  }
}

</mosaic_0001>

<bundles_post_ra>
// kernel: tpu_custom_call.1
= control target key start
LH: loop header
LB: loop body
LE: loop exit
PB: predicated region body
PF: predicated region fallthrough
CT: control target
= control target key end

     0   :  { %9 = vsyncpa [#allocation3], 0  ;;  %s1393_s0 = inlined_call_operand.hbm [shape: f32[2,8,64], index: 0, kind: input, shape index: {}]   ;;  %s1394_s1 = inlined_call_operand.hbm [shape: bf16[64,192], index: 1, kind: input, shape index: {}]   ;;  %s1395_s2 = inlined_call_operand.hbm [shape: bf16[64,64], index: 2, kind: input, shape index: {}]   ;;  %s1396_s3 = inlined_call_operand.vmem [shape: f32[1,64], index: 3, kind: input, shape index: {}]   ;;  %s1397_s4 = inlined_call_operand.hbm [shape: f32[2,8,64], index: 4, kind: output, shape index: {}]  }
   0x1   :  { %11 = vsyncpa [#allocation3 + $0x1], 0 }
   0x2   :  { %12 = vsyncpa [#allocation6], 0 }
   0x3   :  { %13 = vsyncpa [#allocation4], 0 }
   0x4   :  { %15 = vsyncpa [#allocation4 + $0x1], 0  ;;  %s1186_s15 = smov 0   ;;  %s1188_s16 = smov 0  }
   0x5   :  { %s1190_s17 = smov 0   ;;  %s1192_s18 = smov 0  }
   0x6 LB: > { %s152_s21 = sshll.u32 %s1394_s1, 4  ;;  %s1210_s22 = sadd.s32 4294967295, %s1146_s18   ;;  %s1146_s18 = sphi %s1192_s18, %s1408_s18   ;;  %s1142_s17 = sphi %s1190_s17, %s1407_s17   ;;  %s1138_s16 = sphi %s1188_s16, %s1406_s16   ;;  %s1134_s15 = sphi %s1186_s15, %s1405_s15   ;;  %s153_s21 = int_to_ptr.hbm [resolvable:$true] %s152_s21 }
   0x7   : > { %p805_p0 = scmp.ge.s32.totalorder %s1146_s18, 1  ;;  %p42_p1 = scmp.eq.s32.totalorder %s1210_s22, 0 }
   0x8   : > { %p141_p2 = scmp.lt.s32.totalorder %s1146_s18, 3  ;;  %s1148_s24 = smov [#allocation5]  }
   0x9   : > { %s154_s25 = sshll.u32 %s1148_s24, 4  ;;  %s166_s28 = sshll.u32 %s1395_s2, 4  ;;  %s155_s25 = int_to_ptr.vmem [resolvable:$true] %s154_s25  ;;  %s167_s28 = int_to_ptr.hbm [resolvable:$true] %s166_s28 }
   0xa   : > { %p1215_p3 = pnand %p805_p0, %p141_p2  ;;  %s1149_s29 = smov [#allocation7]  }
   0xb   : > { %s168_s30 = sshll.u32 %s1149_s29, 4  ;;  %s1150_s5 = smov 128   ;;  %s169_s30 = int_to_ptr.vmem [resolvable:$true] %s168_s30 }
   0xc   : > { %p903_p4 = pneg %p1215_p3  ;;  %s1151_s6 = smov 8  }
   0xd   : > { %s1152_s7 = smov 64   ;;  %s1153_s8 = smov 4  }
   0xe   : > { %p904_p6 = pnand %p903_p4, %p42_p1  ;;  %s804_s9 = sadd.s32 4294967294, %s1146_s18  }
   0xf   : > { %s1229_s10 = sadd.s32 1, %s1146_s18   ;;  %s28_s12 = sadd.s32 1, %s1142_s17 }
  0x10   : > { %906 = dma.hbm_to_vmem [thread:$0]  (!%p904_p6), %s153_s21, 1024, %s155_s25, [#allocation6], %s1150_s5, %s1150_s5, %s1151_s6  }
  0x11   : > { %909 = dma.hbm_to_vmem [thread:$0]  (!%p904_p6), %s167_s28, 512, %s169_s30, [#allocation6], %s1152_s7, %s1152_s7, %s1153_s8  }
  0x12   : > { %s25_s11 = ssub.s32 %s1146_s18, %s1229_s10  ;;  %p35_p8 = scmp.ne.s32.totalorder %s1142_s17, %s1138_s16 }
  0x13   : > { %p26_p7 = scmp.eq.s32.totalorder %s25_s11, 0  ;;  %p36_p9 = scmp.eq.s32.totalorder %s1146_s18, 0 }
  0x14   : > { %p41_p10 = scmp.ne.s32.totalorder %s1138_s16, %s1134_s15  ;;  %p128_p13 = scmp.eq.s32.totalorder %s1210_s22, 1 }
  0x15   : > { %s1240_s13 = scalar_select %p26_p7, %s1142_s17, %s28_s12  }
  0x16   : > { %p1242_p11 = por %p36_p9, %p35_p8  ;;  %p1248_p12 = por %p42_p1, %p41_p10 }
  0x17   : > { %p134_p0 = scmp.eq.s32.totalorder %s804_s9, 1  ;;  %p920_p2 = scmp.lt.s32.totalorder %s1146_s18, 2 }
  0x18   : > { %s185_s20 = sand.u32 1, %s1142_s17   ;;  %p1255_p4 = por %p128_p13, %p35_p8 }
  0x19   : > { %p1259_p6 = por %p134_p0, %p41_p10  ;;  %s809_s25 = sshll.u32 %s185_s20, 3 }
  0x1a   : > { %s810_s26 = sshll.u32 %s1146_s18, 3  ;;  %s189_s30 = scalar_lea.vmem [#allocation2], %s809_s25 }
  0x1b   : > { %s193_s29 = scalar_lea.hbm %s1393_s0, %s810_s26  ;;  %s197_s5 = sshll.u32 %s189_s30, 4  ;;  %s198_s5 = int_to_ptr.vmem [resolvable:$true] %s197_s5 }
  0x1c   : > { %s195_s6 = sshll.u32 %s193_s29, 4  ;;  %p1269_p7 = pnand %p920_p2, %p1242_p11  ;;  %s196_s6 = int_to_ptr.hbm [resolvable:$true] %s195_s6 }
  0x1d   : > { %s186_s8 = scalar_lea.sflag [#allocation3], %s185_s20  ;;  %s1046_s9 = sshra.s32 %s196_s6, 4  ;;  %s1047_s9 = int_to_ptr.hbm [resolvable:$true] %s1046_s9 }
  0x1e   : > { %s1048_s11 = scalar_lea.hbm %s1047_s9, 8  ;;  %p1050_p9 = pneg %p1269_p7 }
  0x1f   : > { %p1049_p8 = scmp.ne.s32.totalorder %s1047_s9, %s1048_s11  ;;  %s1053_s26 = scalar_lea.hbm %s1393_s0, 16 }
  0x20   : > { %p1054_p11 = scmp.lt.s32.totalorder %s1047_s9, %s1393_s0  ;;  %p1055_p0 = scmp.lt.s32.totalorder %s1053_s26, %s1048_s11 }
  0x21   : > { %p1051_p10 = pnand %p1050_p9, %p1049_p8 }
  0x22   : > { %p1056_p2 = por %p1055_p0, %p1054_p11 }
  0x23   : > { %p1052_p13 = pneg %p1051_p10 }
  0x25   : > { %p1057_p5 = pnand %p1056_p2, %p1052_p13 }
  0x27   : > { %1060 = shalt.err (!%p1057_p5)
}
  0x28   : > { %913 = dma.hbm_to_vmem [thread:$0]  (!%p1269_p7), %s196_s6, 128, %s198_s5, %s186_s8  }
  0x29   : > { %206 = sbr.rel (%p1215_p3) target bundleno = 1272 (0x4f8), region = 36  ;;  %s1286_s20 = sand.u32 (!%p1215_p3), 1, %s1138_s16  }
  0x2a   : > { %s812_s28 = sshll.u32 (!%p1215_p3), %s1286_s20, 3  ;;  %s209_s29 = scalar_lea.sflag (!%p1215_p3), [#allocation3], %s1286_s20 }
  0x2b   : > { %s1292_s30 = scalar_lea.vmem (!%p1215_p3), [#allocation2], %s812_s28 }
  0x2e   : > { %1121 = dma.done.wait (%p1248_p12), %s209_s29, 128  }
  0x2f   : > { %1123 = vsyncadd (%p1248_p12), %s209_s29, 4294967168 }
  0x30   : > { %1125 = dma.done.wait (%p42_p1), [#allocation6], 1536  }
  0x31   : > { %1127 = vsyncadd (%p42_p1), [#allocation6], 4294965760  ;;  %v842_v0 = vld [vmem:[#allocation5 + $0x30] sm:$0xf]  ;;  %v886_v1 = vld [vmem:[#allocation5 + $0x34] sm:$0xf0]  ;;  %v338_v48 = vlaneseq }
  0x32   : > { %v885_v2 = vld [vmem:[#allocation5 + $0x34] sm:$0xf]  ;;  %v843_v3 = vor.u32 %v886_v1, %v842_v0  ;;  %v844_v4 = vld [vmem:[#allocation5 + $0x38] sm:$0xf0]  ;;  %v834_v5 = vld [vmem:[#allocation5 + $0x20] sm:$0xf] }
  0x33   : > { %v884_v6 = vld [vmem:[#allocation5 + $0x24] sm:$0xf0]  ;;  %v847_v7 = vor.u32 %v885_v2, %v844_v4  ;;  %v883_v8 = vld [vmem:[#allocation5 + $0x24] sm:$0xf]  ;;  %v836_v9 = vld [vmem:[#allocation5 + $0x28] sm:$0xf0] }
  0x34   : > { %315 = vmatpush.bf16.msra.mxu0 %v843_v3  ;;  %v835_v10 = vor.u32 %v884_v6, %v834_v5  ;;  %v839_v11 = vor.u32 %v883_v8, %v836_v9  ;;  %v826_v12 = vld [vmem:[#allocation5 + $0x10] sm:$0xf]  ;;  %v882_v13 = vld [vmem:[#allocation5 + $0x14] sm:$0xf0]  ;;  %v881_v14 = vld [vmem:[#allocation5 + $0x14] sm:$0xf] }
  0x35   : > { %328 = vmatpush.bf16.msra.mxu1 %v847_v7  ;;  %v828_v15 = vld [vmem:[#allocation5 + $0x18] sm:$0xf0]  ;;  %v827_v16 = vor.u32 %v882_v13, %v826_v12  ;;  %v818_v18 = vld [vmem:[#allocation5] sm:$0xf]  ;;  %v880_v19 = vld [vmem:[#allocation5 + $0x4] sm:$0xf0] }
  0x36   : > { %v831_v17 = vor.u32 %v881_v14, %v828_v15  ;;  %v879_v20 = vld [vmem:[#allocation5 + $0x4] sm:$0xf]  ;;  %v820_v21 = vld [vmem:[#allocation5 + $0x8] sm:$0xf0]  ;;  %v819_v22 = vor.u32 %v880_v19, %v818_v18  ;;  %v265_v23 = vld [vmem:[%s1292_s30] sm:$0xff]  ;;  %vm307_vm0 = vcmask 523264  }
  0x37   : > { %v823_v24 = vor.u32 %v879_v20, %v820_v21  ;;  %v266_v25 = vpack.c.bf16 %v265_v23, %v265_v23  ;;  %vm386_vm1 = vcmask 1043456   ;;  %s1154_s23 = smov 16   ;;  %s1155_s19 = smov 48   ;;  %vm349_vm2 = vcmask 130048  }
  0x38   : > { %316 = vmatpush.bf16.msra.mxu0 %v835_v10  ;;  %s1156_s5 = smov 64   ;;  %s1157_s6 = smov 80   ;;  %v339_v49 = vshrl.u32 %v338_v48, 7  ;;  %v341_v50 = vand.u32 127, %v338_v48  ;;  %vm370_vm4 = vcmask 64512  }
  0x39   : > { %329 = vmatpush.bf16.msra.mxu1 %v839_v11  ;;  %s1158_s7 = smov 112   ;;  %s1159_s8 = smov 96  }
  0x3a   : > { %s1160_s9 = smov 32   ;;  %vm342_vm3 = vcmp.le.s32.totalorder %v341_v50, %v339_v49  ;;  %s876_s11 = sshll.u32 %s1210_s22, 3 }
  0x3b   : > { %s710_s26 = scalar_lea.hbm %s1397_s4, %s876_s11  ;;  %s247_s29 = scalar_lea.vmem [#allocation8], %s812_s28 }
  0x3c   : > { %317 = vmatpush.bf16.msra.mxu0 %v827_v16  ;;  %s712_s30 = sshll.u32 %s247_s29, 4  ;;  %s700_s22 = scalar_lea.sflag [#allocation4], %s1286_s20  ;;  %s713_s30 = int_to_ptr.vmem [resolvable:$true] %s712_s30 }
  0x3d   : > { %330 = vmatpush.bf16.msra.mxu1 %v831_v17  ;;  %s1096_s28 = scalar_lea.hbm %s1397_s4, 16 }
  0x40   : > { %318 = vmatpush.bf16.msra.mxu0 %v819_v22 }
  0x41   : > { %331 = vmatpush.bf16.msra.mxu1 %v823_v24 }
  0x43   : > { %848 = vmatmul.msk.bf16.vlgmr.msra.gmra.mxu0 %vm307_vm0, %v266_v25 }
  0x44   : > { %849 = vmatmul.msk.bf16.vlgmr.msra.gmra.mxu1 %vm307_vm0, %v266_v25 }
  0xc0   : > { %v320_v26 = vpop.f32.mrf.mxu0 }
  0xc1   : > { %v333_v27 = vpop.f32.mrf.mxu1 }
  0xc2   : > { %v337_v28 = vpack.c.bf16 %v333_v27, %v320_v26 }
  0xc4   : > { %v345_v29 = vunpack.c.l.b16 %v337_v28  ;;  %v381_v30 = vunpack.c.h.b16 %v337_v28 }
  0xc6   : > { %v346_v31 = vpack.c.b16 %v345_v29, %v345_v29  ;;  %v1305_v32 = vpack.c.b16 %v381_v30, %v381_v30 }
  0xc8   : > { %563 = vrot.lane.b32.xlu2 %v346_v31, %s1154_s23  ;;  %421 = vrot.lane.b32.xlu1 %v346_v31, %s1155_s19  ;;  %v322_v33 = vpop.f32.mrf.mxu0  ;;  %v388_v34 = vsel %vm386_vm1, %v1305_v32, 0 }
  0xc9   : > { %347 = vrot.lane.b32.xlu0 %v346_v31, %s1156_s5  ;;  %v335_v35 = vpop.f32.mrf.mxu1  ;;  %397 = vmatpush.bf16.msra.mxu3 %v388_v34 }
  0xd0   : > { %561 = vrot.lane.b32.xlu2 %v346_v31, %s1157_s6  ;;  %419 = vrot.lane.b32.xlu1 %v346_v31, %s1158_s7 }
  0xd8   : > { %490 = vrot.lane.b32.xlu2 %v346_v31, %s1159_s8  ;;  %492 = vrot.lane.b32.xlu1 %v346_v31, %s1160_s9 }
  0xe0   : > { %453 = vrot.lane.b32.xlu2 %v1305_v32, %s1158_s7 }
 0x122   : > { %v564_v36 = vpop.permute.xlu2 %563 }
 0x123   : > { %v569_v3 = vsel %vm349_vm2, %v564_v36, 0 }
 0x12a   : > { %v562_v37 = vpop.permute.xlu2 %561 }
 0x132   : > { %v491_v38 = vpop.permute.xlu2 %490 }
 0x13a   : > { %v454_v39 = vpop.permute.xlu2 %453  ;;  %v422_v40 = vpop.permute.xlu1 %421 }
 0x13b   : > { %v348_v41 = vpop.permute.xlu0 %347  ;;  %v427_v42 = vsel %vm349_vm2, %v422_v40, 0  ;;  %v459_v43 = vsel %vm386_vm1, %v454_v39, 0 }
 0x13c   : > { %v354_v44 = vsel %vm349_vm2, %v348_v41, 0  ;;  %436 = vmatpush.bf16.xpose.msrb.mxu3 %v427_v42 }
 0x13d   : > { %363 = vmatpush.bf16.xpose.msra.mxu2 %v354_v44 }
 0x142   : > { %v420_v45 = vpop.permute.xlu1 %419 }
 0x144   : > { %850 = vmatmul.msk.bf16.vlgmr.msra.gmra.mxu2 %vm349_vm2, %v337_v28 }
 0x145   : > { %468 = vmatpush.bf16.msrb.mxu2 %v459_v43 }
 0x14a   : > { %v493_v46 = vpop.permute.xlu1 %492 }
 0x14b   : > { %v498_v47 = vsel %vm349_vm2, %v493_v46, 0 }
 0x14c   : > { %507 = vmatpush.bf16.xpose.msrb.mxu0 %v498_v47 }
 0x153   : > { %854 = vmatmul.msk.bf16.vlgmr.msrb.gmra.mxu0 %vm349_vm2, %v491_v38 }
 0x1c7   : > { %v365_v51 = vpop.f32.mrf.mxu2 }
 0x1c8   : > { %v369_v52 = vsel %vm342_vm3, %v365_v51, -1e+30 }
 0x1c9   : > { %v371_v53 = vsel %vm370_vm4, %v369_v52, -inf }
 0x1ca   : > { %372 = vmax.xlane.f32.xlu0 %v371_v53 }
 0x1cf   : > { %v367_v54 = vpop.f32.mrf.mxu2 }
 0x1d0   : > { %v509_v55 = vpop.f32.mrf.mxu0 }
 0x1d1   : > { %v513_v56 = vsel %vm342_vm3, %v509_v55, -1e+30 }
 0x1d2   : > { %v514_v57 = vsel %vm370_vm4, %v513_v56, -inf }
 0x1d3   : > { %515 = vmax.xlane.f32.xlu0 %v514_v57 }
 0x1d8   : > { %v511_v58 = vpop.f32.mrf.mxu0 }
 0x1e7   : > { %595 = vrot.lane.b32.xlu0 %v1305_v32, %s1157_s6 }
 0x23d   : > { %v373_v59 = vpop.xlane.xlu0 %372 }
 0x23e   : > { %v374_v60 = vsub.f32 %v369_v52, %v373_v59 }
 0x240   : > { %v375_v61 = vmul.f32 1.442695, %v374_v60 }
 0x242   : > { %970 = vpow2.f32 %v375_v61 }
 0x246   : > { %v516_v62 = vpop.xlane.xlu0 %515 }
 0x247   : > { %v517_v63 = vsub.f32 %v513_v56, %v516_v62 }
 0x248   : > { %v971_v0 = vpop.eup %970 }
 0x249   : > { %v518_v1 = vmul.f32 1.442695, %v517_v63  ;;  %v380_v2 = vpack.c.bf16 %v971_v0, %v971_v0  ;;  %v377_v33 = vsel %vm370_vm4, %v971_v0, 0.0 }
 0x24b   : > { %972 = vpow2.f32 %v518_v1  ;;  %851 = vmatmul.msk.bf16.vlgmr.msra.gmra.mxu3 %vm370_vm4, %v380_v2 }
 0x24c   : > { %578 = vmatpush.bf16.xpose.msra.mxu3 %v569_v3 }
 0x251   : > { %v973_v4 = vpop.eup %972 }
 0x252   : > { %v520_v5 = vsel %vm370_vm4, %v973_v4, 0.0  ;;  %v523_v30 = vpack.c.bf16 %v973_v4, %v973_v4 }
 0x253   : > { %521 = vadd.xlane.f32.xlu0 %v520_v5 }
 0x259   : > { %v596_v6 = vpop.permute.xlu0 %595 }
 0x25a   : > { %v601_v7 = vsel %vm386_vm1, %v596_v6, 0 }
 0x25b   : > { %852 = vmatmul.msk.bf16.vlgmr.msrb.gmra.mxu3 %vm349_vm2, %v420_v45  ;;  %610 = vmatpush.bf16.msra.mxu2 %v601_v7 }
 0x26b   : > { %856 = vmatmul.msk.bf16.vlgmr.msra.gmra.mxu3 %vm349_vm2, %v562_v37 }
 0x2c6   : > { %v522_v34 = vpop.xlane.xlu0 %521 }
 0x2c7   : > { %v556_v54 = vand.u32 2147483648, %v522_v34  ;;  %vm550_vm10 = vweird.f32 %v522_v34  ;;  %v554_v56 = vand.u32 2147483647, %v522_v34 }
 0x2c9   : > { %v557_v62 = vor.u32 1.1754944e-38, %v556_v54  ;;  %vm555_vm12 = vcmp.eq.f32.partialorder %v554_v56, 8.507059e+37 }
 0x2ce   : > { %v1333_v8 = vpop.f32.mrf.mxu3 }
 0x2d6   : > { %v401_v9 = vpop.f32.mrf.mxu3 }
 0x2de   : > { %v438_v10 = vpop.f32.mrf.mxu3 }
 0x2df   : > { %v442_v11 = vsel %vm342_vm3, %v438_v10, -1e+30 }
 0x2e0   : > { %v443_v12 = vsel %vm370_vm4, %v442_v11, -inf }
 0x2e1   : > { %444 = vmax.xlane.f32.xlu1 %v443_v12 }
 0x2e6   : > { %v440_v13 = vpop.f32.mrf.mxu3 }
 0x2ee   : > { %v580_v14 = vpop.f32.mrf.mxu3 }
 0x2ef   : > { %v584_v15 = vsel %vm342_vm3, %v580_v14, -1e+30 }
 0x2f0   : > { %v585_v16 = vsel %vm370_vm4, %v584_v15, -inf }
 0x2f1   : > { %586 = vmax.xlane.f32.xlu2 %v585_v16 }
 0x2f6   : > { %v582_v17 = vpop.f32.mrf.mxu3 }
 0x2fa   : > { %524 = vrot.lane.b32.xlu1 %v1305_v32, %s1159_s8 }
 0x354   : > { %v445_v18 = vpop.xlane.xlu1 %444 }
 0x355   : > { %v446_v19 = vsub.f32 %v442_v11, %v445_v18 }
 0x357   : > { %v447_v20 = vmul.f32 1.442695, %v446_v19 }
 0x359   : > { %974 = vpow2.f32 %v447_v20 }
 0x35f   : > { %v975_v21 = vpop.eup %974 }
 0x360   : > { %v449_v22 = vsel %vm370_vm4, %v975_v21, 0.0  ;;  %v452_v23 = vpack.c.bf16 %v975_v21, %v975_v21 }
 0x361   : > { %450 = vadd.xlane.f32.xlu2 %v449_v22  ;;  %v890_v22 = vld [vmem:[#allocation7 + $0x18] sm:$0xff] }
 0x362   : > { %853 = vmatmul.msk.bf16.vlgmr.msrb.gmra.mxu2 %vm370_vm4, %v452_v23  ;;  %689 = vmatpush.bf16.msra.mxu0 %v890_v22  ;;  %v889_v23 = vld [vmem:[#allocation7 + $0x10] sm:$0xff] }
 0x364   : > { %v587_v24 = vpop.xlane.xlu2 %586 }
 0x365   : > { %v588_v25 = vsub.f32 %v584_v15, %v587_v24 }
 0x366   : > { %690 = vmatpush.bf16.msra.mxu0 %v889_v23 }
 0x367   : > { %v589_v26 = vmul.f32 1.442695, %v588_v25  ;;  %v888_v25 = vld [vmem:[#allocation7 + $0x8] sm:$0xff] }
 0x369   : > { %976 = vpow2.f32 %v589_v26  ;;  %v887_v26 = vld [vmem:[#allocation7] sm:$0xff] }
 0x36a   : > { %978 = vrcp.f32 %v522_v34  ;;  %691 = vmatpush.bf16.msra.mxu0 %v888_v25 }
 0x36c   : > { %v525_v27 = vpop.permute.xlu1 %524 }
 0x36d   : > { %v530_v28 = vsel %vm386_vm1, %v525_v27, 0 }
 0x36e   : > { %539 = vmatpush.bf16.msrb.mxu1 %v530_v28  ;;  %692 = vmatpush.bf16.msra.mxu0 %v887_v26 }
 0x36f   : > { %v977_v29 = vpop.eup %976 }
 0x370   : > { %v594_v31 = vpack.c.bf16 %v977_v29, %v977_v29  ;;  %v591_v32 = vsel %vm370_vm4, %v977_v29, 0.0  ;;  %v979_v36 = vpop.eup %978 }
 0x371   : > { %592 = vadd.xlane.f32.xlu2 %v591_v32  ;;  %855 = vmatmul.msk.bf16.vlgmr.msrb.gmra.mxu1 %vm370_vm4, %v523_v30  ;;  %v546_v38 = vmul.f32 %v979_v36, %v522_v34  ;;  %vm551_vm9 = vweird.f32 %v979_v36 }
 0x372   : > { %857 = vmatmul.msk.bf16.vlgmr.msra.gmra.mxu2 %vm370_vm4, %v594_v31  ;;  %vm552_vm11 = vmor %vm550_vm10, %vm551_vm9 }
 0x373   : > { %v547_v41 = vsub.f32 1.0, %v546_v38 }
 0x375   : > { %v548_v46 = vmul.f32 %v979_v36, %v547_v41 }
 0x377   : > { %v549_v53 = vadd.f32 %v979_v36, %v548_v46 }
 0x379   : > { %378 = vadd.xlane.f32.xlu2 %v377_v33  ;;  %v553_v59 = vsel %vm552_vm11, %v979_v36, %v549_v53 }
 0x37a   : > { %v558_v2 = vsel %vm555_vm12, %v557_v62, %v553_v59 }
 0x3d4   : > { %v451_v35 = vpop.xlane.xlu2 %450 }
 0x3d5   : > { %980 = vrcp.f32 %v451_v35  ;;  %v485_v42 = vand.u32 2147483648, %v451_v35  ;;  %v483_v44 = vand.u32 2147483647, %v451_v35  ;;  %vm479_vm6 = vweird.f32 %v451_v35 }
 0x3d7   : > { %v486_v47 = vor.u32 1.1754944e-38, %v485_v42  ;;  %vm484_vm8 = vcmp.eq.f32.partialorder %v483_v44, 8.507059e+37 }
 0x3db   : > { %v981_v37 = vpop.eup %980 }
 0x3dc   : > { %v475_v39 = vmul.f32 %v981_v37, %v451_v35  ;;  %vm480_vm5 = vweird.f32 %v981_v37 }
 0x3dd   : > { %vm481_vm7 = vmor %vm479_vm6, %vm480_vm5 }
 0x3de   : > { %v476_v40 = vsub.f32 1.0, %v475_v39 }
 0x3e0   : > { %v477_v43 = vmul.f32 %v981_v37, %v476_v40 }
 0x3e2   : > { %v478_v45 = vadd.f32 %v981_v37, %v477_v43 }
 0x3e4   : > { %v593_v48 = vpop.xlane.xlu2 %592  ;;  %v482_v49 = vsel %vm481_vm7, %v981_v37, %v478_v45  ;;  %vm650_vm7 = vcmask 261120  }
 0x3e5   : > { %982 = vrcp.f32 %v593_v48  ;;  %v470_v50 = vpop.f32.mrf.mxu2  ;;  %v487_v51 = vsel %vm484_vm8, %v486_v47, %v482_v49  ;;  %v627_v4 = vand.u32 2147483648, %v593_v48  ;;  %v625_v6 = vand.u32 2147483647, %v593_v48 }
 0x3e6   : > { %v488_v52 = vmul.f32 %v487_v51, %v470_v50  ;;  %vm621_vm14 = vweird.f32 %v593_v48  ;;  %vm653_vm8 = vcmask 392192  }
 0x3e7   : > { %v628_v11 = vor.u32 1.1754944e-38, %v627_v4  ;;  %vm626_vm1 = vcmp.eq.f32.partialorder %v625_v6, 8.507059e+37 }
 0x3e8   : > { %v489_v55 = vpack.c.bf16 %v488_v52, %v488_v52 }
 0x3ea   : > { %v633_v57 = vunpack.c.l.b16 %v489_v55 }
 0x3eb   : > { %v983_v58 = vpop.eup %982 }
 0x3ec   : > { %v617_v60 = vmul.f32 %v983_v58, %v593_v48  ;;  %v634_v61 = vpack.c.b16 %v633_v57, %v633_v57  ;;  %vm622_vm13 = vweird.f32 %v983_v58  ;;  %v379_v24 = vpop.xlane.xlu2 %378 }
 0x3ed   : > { %v472_v63 = vpop.f32.mrf.mxu2  ;;  %vm623_vm15 = vmor %vm621_vm14, %vm622_vm13  ;;  %984 = vrcp.f32 %v379_v24  ;;  %v414_v32 = vand.u32 2147483648, %v379_v24  ;;  %vm408_vm4 = vweird.f32 %v379_v24  ;;  %v412_v33 = vand.u32 2147483647, %v379_v24 }
 0x3ee   : > { %v618_v0 = vsub.f32 1.0, %v617_v60  ;;  %635 = vrot.lane.b32.xlu1 %v634_v61, %s1154_s23  ;;  %v541_v1 = vpop.f32.mrf.mxu1  ;;  %s714_s23 = sshll.u32 %s710_s26, 4  ;;  %s715_s23 = int_to_ptr.hbm [resolvable:$true] %s714_s23 }
 0x3ef   : > { %v559_v3 = vmul.f32 %v558_v2, %v541_v1  ;;  %v415_v35 = vor.u32 1.1754944e-38, %v414_v32  ;;  %vm413_vm6 = vcmp.eq.f32.partialorder %v412_v33, 8.507059e+37 }
 0x3f0   : > { %v619_v5 = vmul.f32 %v983_v58, %v618_v0 }
 0x3f1   : > { %v560_v7 = vpack.c.bf16 %v559_v3, %v559_v3 }
 0x3f2   : > { %v620_v9 = vadd.f32 %v983_v58, %v619_v5 }
 0x3f3   : > { %v638_v10 = vunpack.c.l.b16 %v560_v7  ;;  %v985_v27 = vpop.eup %984 }
 0x3f4   : > { %v624_v12 = vsel %vm623_vm15, %v983_v58, %v620_v9  ;;  %v404_v28 = vmul.f32 %v985_v27, %v379_v24  ;;  %vm409_vm3 = vweird.f32 %v985_v27 }
 0x3f5   : > { %v639_v13 = vpack.c.b16 %v638_v10, %v638_v10  ;;  %v612_v14 = vpop.f32.mrf.mxu2  ;;  %v629_v15 = vsel %vm626_vm1, %v628_v11, %v624_v12  ;;  %vm410_vm5 = vmor %vm408_vm4, %vm409_vm3 }
 0x3f6   : > { %v630_v16 = vmul.f32 %v629_v15, %v612_v14  ;;  %v543_v17 = vpop.f32.mrf.mxu1  ;;  %v405_v29 = vsub.f32 1.0, %v404_v28 }
 0x3f7   : > { %640 = vrot.lane.b32.xlu2 %v639_v13, %s1160_s9 }
 0x3f8   : > { %v631_v18 = vpack.c.bf16 %v630_v16, %v630_v16  ;;  %v406_v30 = vmul.f32 %v985_v27, %v405_v29 }
 0x3fa   : > { %v643_v19 = vunpack.c.l.b16 %v631_v18  ;;  %v407_v31 = vadd.f32 %v985_v27, %v406_v30 }
 0x3fc   : > { %v644_v20 = vpack.c.b16 %v643_v19, %v643_v19  ;;  %v411_v34 = vsel %vm410_vm5, %v985_v27, %v407_v31 }
 0x3fd   : > { %v614_v21 = vpop.f32.mrf.mxu2  ;;  %v416_v36 = vsel %vm413_vm6, %v415_v35, %v411_v34 }
 0x3fe   : > { %645 = vrot.lane.b32.xlu1 %v644_v20, %s1155_s19  ;;  %v417_v37 = vmul.f32 %v416_v36, %v1333_v8  ;;  %v969_v8 = vld [vmem:[%s1396_s3] ss:$0 sm:$0xff]  ;;  %s1090_s19 = sshra.s32 %s715_s23, 4  ;;  %s1091_s19 = int_to_ptr.hbm [resolvable:$true] %s1090_s19 }
 0x3ff   : > { %s1092_s5 = scalar_lea.hbm %s1091_s19, 8  ;;  %p1097_p12 = scmp.lt.s32.totalorder %s1091_s19, %s1397_s4 }
 0x400   : > { %v418_v39 = vpack.c.bf16 %v417_v37, %v417_v37  ;;  %p1093_p1 = scmp.ne.s32.totalorder %s1091_s19, %s1092_s5  ;;  %p1098_p7 = scmp.lt.s32.totalorder %s1096_s28, %s1092_s5 }
 0x402   : > { %p1094_p3 = pnand %p1093_p1, %p1255_p4  ;;  %p1099_p8 = por %p1098_p7, %p1097_p12 }
 0x404   : > { %p1095_p5 = pneg %p1094_p3 }
 0x406   : > { %p1100_p9 = pnand %p1099_p8, %p1095_p5 }
 0x451   : > { %v641_v41 = vpop.permute.xlu2 %640 }
 0x460   : > { %v636_v38 = vpop.permute.xlu1 %635 }
 0x461   : > { %v649_v40 = vsel %vm349_vm2, %v418_v39, %v636_v38 }
 0x462   : > { %v652_v43 = vsel %vm650_vm7, %v649_v40, %v641_v41 }
 0x470   : > { %v646_v42 = vpop.permute.xlu1 %645 }
 0x471   : > { %v655_v44 = vsel %vm653_vm8, %v652_v43, %v646_v42 }
 0x472   : > { %874 = vmatmul.msk.bf16.vlgmr.msra.gmra.mxu0 %vm307_vm0, %v655_v44 }
 0x4ef   : > { %v694_v45 = vpop.f32.mrf.mxu0 }
 0x4f0   : > { %v695_v46 = vadd.f32 %v969_v8, %v694_v45 }
 0x4f2   : > { %698 = vst.msk [vmem:[%s247_s29] sm:$0xff] %vm307_vm0, %v695_v46 }
 0x4f3   : > { %1103 = shalt.err (!%p1100_p9)
}
 0x4f4   : > { %901 = dma.vmem_to_hbm [thread:$0]  (%p1255_p4), %s713_s30, 128, %s715_s23, %s700_s22  }
 0x4f7   : > { %v696_v47 = vpop.f32.mrf.mxu0 }
 0x4f8 PF: > { %s726_s20 = sand.u32 1, %s1134_s15   ;;  %p1404_p10 = scmp.ge.s32.totalorder %s1146_s18, 2 }
 0x4f9   : > { %s727_s11 = scalar_lea.sflag [#allocation4], %s726_s20 }
 0x4fa   : > { %p915_p13 = pnand %p1404_p10, %p1259_p6 }
 0x4fc   : > { %p916_p11 = pneg %p915_p13 }
 0x4fe   : > { %1129 = dma.done.wait (%p916_p11), %s727_s11, 128  }
 0x4ff   : > { %1131 = vsyncadd (%p916_p11), %s727_s11, 4294967168  ;;  %p18_p0 = scmp.ge.s32.totalorder %s1229_s10, 4   ;;  %s1405_s15 = smov %s1138_s16 }
 0x500   : > { %s1406_s16 = smov %s1142_s17  ;;  %s1407_s17 = smov %s1240_s13 }
 0x501   : > { %s1408_s18 = smov %s1229_s10  ;;  %20 = sbr.rel (!%p18_p0) target bundleno = 6 (0x6), region = 89 }
 0x506   :  { %733 = vsyncpa [#allocation3], 1 }
 0x507   :  { %735 = vsyncpa [#allocation3 + $0x1], 1 }
 0x508   :  { %736 = vsyncpa [#allocation6], 1 }
 0x509   :  { %737 = vsyncpa [#allocation4], 1 }
 0x50a   :  { %739 = vsyncpa [#allocation4 + $0x1], 1 }

</bundles_post_ra>
